<compile_context>
chip_gen: v7x
topology: tpu7x:2x2x1
jax: 0.10.0
libtpu: 0.0.40
codegen_flags: <defaults>
</compile_context>

<pallas_src>
import functools

import jax
import jax.numpy as jnp
from jax.experimental import pallas as pl
from jax.experimental.pallas import tpu as pltpu


def _sigmoid(x):
    # exp and reciprocal both lower to the EUP slot; f32 in / f32 out.
    return pl.reciprocal(1.0 + jnp.exp(-x), approx=True)


def critic_kernel(s_ref, a_ref,
                  w1s_ref, w1a_ref, w2_ref, w3_ref, w4_ref,
                  b1_ref, b2_ref, b3_ref, b4_ref,
                  o_ref):
    """Whole 4-layer MLP on one batch tile.

    s_ref  : (TB, state_dim)   bf16
    a_ref  : (TB, action_dim)  bf16
    w*_ref : pre-transposed (in, out) bf16 weight slabs (full refs, no slicing)
    b*_ref : (1, out) f32 biases
    o_ref  : (TB, out) f32
    """
    s = s_ref[...]
    a = a_ref[...]

    # Layer 1: fused concat -> split-K matmul on separately packed W1 slabs.
    x = (jnp.dot(s, w1s_ref[...], preferred_element_type=jnp.float32)
         + jnp.dot(a, w1a_ref[...], preferred_element_type=jnp.float32)
         + b1_ref[...])
    x = _sigmoid(x)

    # Layer 2
    x = jnp.dot(x.astype(jnp.bfloat16), w2_ref[...],
                preferred_element_type=jnp.float32) + b2_ref[...]
    x = _sigmoid(x)

    # Layer 3
    x = jnp.dot(x.astype(jnp.bfloat16), w3_ref[...],
                preferred_element_type=jnp.float32) + b3_ref[...]
    x = _sigmoid(x)

    # Layer 4 + tanh (output is narrow (TB, out) -> masked stores; cheap at out=4).
    x = jnp.dot(x.astype(jnp.bfloat16), w4_ref[...],
                preferred_element_type=jnp.float32) + b4_ref[...]
    o_ref[...] = jnp.tanh(x)


def prepare_critic_params(params, state_dim):
    """One-time packing of PyTorch-style (out, in) weights into kernel layout.

    Transpose to (in, out), split W1 into state-rows / action-rows, cast weights to
    bf16 (MXU-native), keep biases f32. Call ONCE at init; not on the per-call path.
    """
    w1t = params["w1"].T  # (input_size, hidden)
    return dict(
        w1s=w1t[:state_dim].astype(jnp.bfloat16),
        w1a=w1t[state_dim:].astype(jnp.bfloat16),
        w2=params["w2"].T.astype(jnp.bfloat16),
        w3=params["w3"].T.astype(jnp.bfloat16),
        w4=params["w4"].T.astype(jnp.bfloat16),
        b1=params["b1"].reshape(1, -1).astype(jnp.float32),
        b2=params["b2"].reshape(1, -1).astype(jnp.float32),
        b3=params["b3"].reshape(1, -1).astype(jnp.float32),
        b4=params["b4"].reshape(1, -1).astype(jnp.float32),
    )


@functools.partial(jax.jit, static_argnames=("block_b",))
def critic_forward(state, action, packed, block_b=1024):
    """Jitted wrapper: batch-tiled pallas_call with VMEM-resident bf16 weights."""
    state = state.astype(jnp.bfloat16)
    action = action.astype(jnp.bfloat16)

    b, state_dim = state.shape
    action_dim = action.shape[1]
    out = packed["w4"].shape[1]

    # Tile selection:
    #  * tiny batches (<=16): single full block, no padding.
    #  * otherwise at least 2 tiles (both v7x TensorCores get work via "parallel"),
    #    balanced so padding is < 8 rows per tile; each tile a multiple of 8 sublanes.
    if b <= 16:
        n_tiles = 1
        tb = b
    else:
        n_tiles = max(2, pl.cdiv(b, block_b))
        tb = ((pl.cdiv(b, n_tiles) + 7) // 8) * 8
    bp = n_tiles * tb
    if bp != b:
        state = jnp.pad(state, ((0, bp - b), (0, 0)))
        action = jnp.pad(action, ((0, bp - b), (0, 0)))

    param_order = ("w1s", "w1a", "w2", "w3", "w4", "b1", "b2", "b3", "b4")
    param_args = [packed[k] for k in param_order]
    # Full-array blocks with a constant index_map -> stay resident in VMEM across the
    # whole grid, never re-fetched, never sliced inside the kernel.
    param_specs = [pl.BlockSpec(p.shape, lambda i: (0, 0)) for p in param_args]

    result = pl.pallas_call(
        critic_kernel,
        out_shape=jax.ShapeDtypeStruct((bp, out), jnp.float32),
        grid_spec=pltpu.PrefetchScalarGridSpec(
            num_scalar_prefetch=0,
            grid=(n_tiles,),
            in_specs=[
                pl.BlockSpec((tb, state_dim), lambda i: (i, 0)),
                pl.BlockSpec((tb, action_dim), lambda i: (i, 0)),
                *param_specs,
            ],
            out_specs=pl.BlockSpec((tb, out), lambda i: (i, 0)),
        ),
        compiler_params=pltpu.CompilerParams(
            dimension_semantics=("parallel",)),
    )(state, action, *param_args)
    return result[:b]


def init_critic_params(key, input_size, hidden_size, hidden_size2, output_size):
    """Deterministic synthetic parameters, PyTorch nn.Linear-style (out, in) weights."""
    dims = [(hidden_size, input_size),
            (hidden_size, hidden_size),
            (hidden_size2, hidden_size),
            (output_size, hidden_size2)]
    params = {}
    for i, (out_d, in_d) in enumerate(dims, start=1):
        key, kw, kb = jax.random.split(key, 3)
        bound = 1.0 / jnp.sqrt(in_d)
        params[f"w{i}"] = jax.random.uniform(kw, (out_d, in_d), jnp.float32, -bound, bound)
        params[f"b{i}"] = jax.random.uniform(kb, (out_d,), jnp.float32, -bound, bound)
    return params


def critic_reference(state, action, params):
    """Pure-JAX f32 reference for correctness checking."""
    x = jnp.concatenate([state, action], axis=1)
    x = jax.nn.sigmoid(x @ params["w1"].T + params["b1"])
    x = jax.nn.sigmoid(x @ params["w2"].T + params["b2"])
    x = jax.nn.sigmoid(x @ params["w3"].T + params["b3"])
    x = jnp.tanh(x @ params["w4"].T + params["b4"])
    return x


if __name__ == "__main__":
    batch = 2
    state_dim = 24
    action_dim = 8
    input_size = state_dim + action_dim   # 32
    hidden_size = 32
    hidden_size2 = 32
    output_size = 4

    key = jax.random.PRNGKey(0)
    key, ks, ka, kp = jax.random.split(key, 4)
    state = jax.random.normal(ks, (batch, state_dim), jnp.float32)
    action = jax.random.normal(ka, (batch, action_dim), jnp.float32)
    params = init_critic_params(kp, input_size, hidden_size, hidden_size2, output_size)

    # One-time param packing (transpose + split + bf16 cast) — off the per-call path.
    packed = prepare_critic_params(params, state_dim)

    out = critic_forward(state, action, packed)
    out = jax.block_until_ready(out)

    ref = critic_reference(state, action, params)
    assert out.shape == (batch, output_size)
    # bf16 matmul operands + approx reciprocal -> loosened tolerance vs f32 reference.
    assert jnp.allclose(out, ref, atol=2e-2, rtol=2e-2), "mismatch vs reference"

    print("KERNEL_OK")
</pallas_src>

<mosaic_0001>
module attributes {stable_mosaic.version = 11 : i64} {
  func.func @critic_kernel(%arg0: i32, %arg1: memref<2x24xbf16, #tpu.memory_space<vmem>>, %arg2: memref<2x8xbf16, #tpu.memory_space<vmem>>, %arg3: memref<24x32xbf16, #tpu.memory_space<vmem>>, %arg4: memref<8x32xbf16, #tpu.memory_space<vmem>>, %arg5: memref<32x32xbf16, #tpu.memory_space<vmem>>, %arg6: memref<32x32xbf16, #tpu.memory_space<vmem>>, %arg7: memref<32x4xbf16, #tpu.memory_space<vmem>>, %arg8: memref<1x32xf32, #tpu.memory_space<vmem>>, %arg9: memref<1x32xf32, #tpu.memory_space<vmem>>, %arg10: memref<1x32xf32, #tpu.memory_space<vmem>>, %arg11: memref<1x4xf32, #tpu.memory_space<vmem>>, %arg12: memref<2x4xf32, #tpu.memory_space<vmem>>) attributes {dimension_semantics = [#tpu.dimension_semantics<parallel>], iteration_bounds = array<i64: 1>, scalar_prefetch = 0 : i64, scratch_operands = 0 : i64, tpu.core_type = #tpu.core_type<tc>, window_params = [{transform_indices = @transform_0, window_bounds = array<i64: 2, 24>}, {transform_indices = @transform_1, window_bounds = array<i64: 2, 8>}, {pipeline_mode = #tpu.pipeline_mode<synchronous>, transform_indices = @transform_2, window_bounds = array<i64: 24, 32>}, {pipeline_mode = #tpu.pipeline_mode<synchronous>, transform_indices = @transform_3, window_bounds = array<i64: 8, 32>}, {pipeline_mode = #tpu.pipeline_mode<synchronous>, transform_indices = @transform_4, window_bounds = array<i64: 32, 32>}, {pipeline_mode = #tpu.pipeline_mode<synchronous>, transform_indices = @transform_5, window_bounds = array<i64: 32, 32>}, {pipeline_mode = #tpu.pipeline_mode<synchronous>, transform_indices = @transform_6, window_bounds = array<i64: 32, 4>}, {pipeline_mode = #tpu.pipeline_mode<synchronous>, transform_indices = @transform_7, window_bounds = array<i64: 1, 32>}, {pipeline_mode = #tpu.pipeline_mode<synchronous>, transform_indices = @transform_8, window_bounds = array<i64: 1, 32>}, {pipeline_mode = #tpu.pipeline_mode<synchronous>, transform_indices = @transform_9, window_bounds = array<i64: 1, 32>}, {pipeline_mode = #tpu.pipeline_mode<synchronous>, transform_indices = @transform_10, window_bounds = array<i64: 1, 4>}, {transform_indices = @transform_11, window_bounds = array<i64: 2, 4>}]} {
    %c0 = arith.constant 0 : index
    %c0_0 = arith.constant 0 : index
    %0 = vector.load %arg1[%c0, %c0_0] : memref<2x24xbf16, #tpu.memory_space<vmem>>, vector<2x24xbf16>
    %c0_1 = arith.constant 0 : index
    %c0_2 = arith.constant 0 : index
    %1 = vector.load %arg2[%c0_1, %c0_2] : memref<2x8xbf16, #tpu.memory_space<vmem>>, vector<2x8xbf16>
    %c0_3 = arith.constant 0 : index
    %c0_4 = arith.constant 0 : index
    %2 = vector.load %arg3[%c0_3, %c0_4] : memref<24x32xbf16, #tpu.memory_space<vmem>>, vector<24x32xbf16>
    %cst = arith.constant dense<0.000000e+00> : vector<2x32xf32>
    %3 = tpu.matmul %0, %2, %cst {dimension_numbers = #tpu.dot_dimension_numbers<[1], [0], [0], [1], [0, 0, 1, 1], [], []>} : vector<2x24xbf16>, vector<24x32xbf16>, vector<2x32xf32> -> vector<2x32xf32>
    %c0_5 = arith.constant 0 : index
    %c0_6 = arith.constant 0 : index
    %4 = vector.load %arg4[%c0_5, %c0_6] : memref<8x32xbf16, #tpu.memory_space<vmem>>, vector<8x32xbf16>
    %cst_7 = arith.constant dense<0.000000e+00> : vector<2x32xf32>
    %5 = tpu.matmul %1, %4, %cst_7 {dimension_numbers = #tpu.dot_dimension_numbers<[1], [0], [0], [1], [0, 0, 1, 1], [], []>} : vector<2x8xbf16>, vector<8x32xbf16>, vector<2x32xf32> -> vector<2x32xf32>
    %6 = arith.addf %3, %5 : vector<2x32xf32>
    %c0_8 = arith.constant 0 : index
    %c0_9 = arith.constant 0 : index
    %7 = vector.load %arg8[%c0_8, %c0_9] : memref<1x32xf32, #tpu.memory_space<vmem>>, vector<1x32xf32>
    %8 = vector.broadcast %7 : vector<1x32xf32> to vector<2x32xf32>
    %9 = arith.addf %6, %8 : vector<2x32xf32>
    %cst_10 = arith.constant 0.000000e+00 : f32
    %10 = vector.broadcast %cst_10 : f32 to vector<2x32xf32>
    %11 = arith.subf %10, %9 : vector<2x32xf32>
    %12 = math.exp %11 : vector<2x32xf32>
    %cst_11 = arith.constant 1.000000e+00 : f32
    %13 = vector.broadcast %cst_11 : f32 to vector<2x32xf32>
    %14 = arith.addf %13, %12 : vector<2x32xf32>
    %15 = tpu.reciprocal %14 {approx = true} : vector<2x32xf32> -> vector<2x32xf32>
    %16 = arith.truncf %15 : vector<2x32xf32> to vector<2x32xbf16>
    %c0_12 = arith.constant 0 : index
    %c0_13 = arith.constant 0 : index
    %17 = vector.load %arg5[%c0_12, %c0_13] : memref<32x32xbf16, #tpu.memory_space<vmem>>, vector<32x32xbf16>
    %cst_14 = arith.constant dense<0.000000e+00> : vector<2x32xf32>
    %18 = tpu.matmul %16, %17, %cst_14 {dimension_numbers = #tpu.dot_dimension_numbers<[1], [0], [0], [1], [0, 0, 1, 1], [], []>} : vector<2x32xbf16>, vector<32x32xbf16>, vector<2x32xf32> -> vector<2x32xf32>
    %c0_15 = arith.constant 0 : index
    %c0_16 = arith.constant 0 : index
    %19 = vector.load %arg9[%c0_15, %c0_16] : memref<1x32xf32, #tpu.memory_space<vmem>>, vector<1x32xf32>
    %20 = vector.broadcast %19 : vector<1x32xf32> to vector<2x32xf32>
    %21 = arith.addf %18, %20 : vector<2x32xf32>
    %cst_17 = arith.constant 0.000000e+00 : f32
    %22 = vector.broadcast %cst_17 : f32 to vector<2x32xf32>
    %23 = arith.subf %22, %21 : vector<2x32xf32>
    %24 = math.exp %23 : vector<2x32xf32>
    %cst_18 = arith.constant 1.000000e+00 : f32
    %25 = vector.broadcast %cst_18 : f32 to vector<2x32xf32>
    %26 = arith.addf %25, %24 : vector<2x32xf32>
    %27 = tpu.reciprocal %26 {approx = true} : vector<2x32xf32> -> vector<2x32xf32>
    %28 = arith.truncf %27 : vector<2x32xf32> to vector<2x32xbf16>
    %c0_19 = arith.constant 0 : index
    %c0_20 = arith.constant 0 : index
    %29 = vector.load %arg6[%c0_19, %c0_20] : memref<32x32xbf16, #tpu.memory_space<vmem>>, vector<32x32xbf16>
    %cst_21 = arith.constant dense<0.000000e+00> : vector<2x32xf32>
    %30 = tpu.matmul %28, %29, %cst_21 {dimension_numbers = #tpu.dot_dimension_numbers<[1], [0], [0], [1], [0, 0, 1, 1], [], []>} : vector<2x32xbf16>, vector<32x32xbf16>, vector<2x32xf32> -> vector<2x32xf32>
    %c0_22 = arith.constant 0 : index
    %c0_23 = arith.constant 0 : index
    %31 = vector.load %arg10[%c0_22, %c0_23] : memref<1x32xf32, #tpu.memory_space<vmem>>, vector<1x32xf32>
    %32 = vector.broadcast %31 : vector<1x32xf32> to vector<2x32xf32>
    %33 = arith.addf %30, %32 : vector<2x32xf32>
    %cst_24 = arith.constant 0.000000e+00 : f32
    %34 = vector.broadcast %cst_24 : f32 to vector<2x32xf32>
    %35 = arith.subf %34, %33 : vector<2x32xf32>
    %36 = math.exp %35 : vector<2x32xf32>
    %cst_25 = arith.constant 1.000000e+00 : f32
    %37 = vector.broadcast %cst_25 : f32 to vector<2x32xf32>
    %38 = arith.addf %37, %36 : vector<2x32xf32>
    %39 = tpu.reciprocal %38 {approx = true} : vector<2x32xf32> -> vector<2x32xf32>
    %40 = arith.truncf %39 : vector<2x32xf32> to vector<2x32xbf16>
    %c0_26 = arith.constant 0 : index
    %c0_27 = arith.constant 0 : index
    %41 = vector.load %arg7[%c0_26, %c0_27] : memref<32x4xbf16, #tpu.memory_space<vmem>>, vector<32x4xbf16>
    %cst_28 = arith.constant dense<0.000000e+00> : vector<2x4xf32>
    %42 = tpu.matmul %40, %41, %cst_28 {dimension_numbers = #tpu.dot_dimension_numbers<[1], [0], [0], [1], [0, 0, 1, 1], [], []>} : vector<2x32xbf16>, vector<32x4xbf16>, vector<2x4xf32> -> vector<2x4xf32>
    %c0_29 = arith.constant 0 : index
    %c0_30 = arith.constant 0 : index
    %43 = vector.load %arg11[%c0_29, %c0_30] : memref<1x4xf32, #tpu.memory_space<vmem>>, vector<1x4xf32>
    %44 = vector.broadcast %43 : vector<1x4xf32> to vector<2x4xf32>
    %45 = arith.addf %42, %44 : vector<2x4xf32>
    %46 = math.tanh %45 : vector<2x4xf32>
    %c0_31 = arith.constant 0 : index
    %c0_32 = arith.constant 0 : index
    %47 = vector.load %arg12[%c0_31, %c0_32] : memref<2x4xf32, #tpu.memory_space<vmem>>, vector<2x4xf32>
    tpu.vector_store %arg12[%c0_31, %c0_32], %46 {strides = array<i32>} : memref<2x4xf32, #tpu.memory_space<vmem>>, vector<2x4xf32>,
    return
  }
  func.func @transform_0(%arg0: i32) -> (i32, i32) {
    %c0_i32 = arith.constant 0 : i32
    %c0_i32_0 = arith.constant 0 : i32
    return %arg0, %c0_i32 : i32, i32
  }
  func.func @transform_1(%arg0: i32) -> (i32, i32) {
    %c0_i32 = arith.constant 0 : i32
    %c0_i32_0 = arith.constant 0 : i32
    return %arg0, %c0_i32 : i32, i32
  }
  func.func @transform_2(%arg0: i32) -> (i32, i32) {
    %c0_i32 = arith.constant 0 : i32
    %c0_i32_0 = arith.constant 0 : i32
    %c0_i32_1 = arith.constant 0 : i32
    return %c0_i32, %c0_i32_0 : i32, i32
  }
  func.func @transform_3(%arg0: i32) -> (i32, i32) {
    %c0_i32 = arith.constant 0 : i32
    %c0_i32_0 = arith.constant 0 : i32
    %c0_i32_1 = arith.constant 0 : i32
    return %c0_i32, %c0_i32_0 : i32, i32
  }
  func.func @transform_4(%arg0: i32) -> (i32, i32) {
    %c0_i32 = arith.constant 0 : i32
    %c0_i32_0 = arith.constant 0 : i32
    %c0_i32_1 = arith.constant 0 : i32
    return %c0_i32, %c0_i32_0 : i32, i32
  }
  func.func @transform_5(%arg0: i32) -> (i32, i32) {
    %c0_i32 = arith.constant 0 : i32
    %c0_i32_0 = arith.constant 0 : i32
    %c0_i32_1 = arith.constant 0 : i32
    return %c0_i32, %c0_i32_0 : i32, i32
  }
  func.func @transform_6(%arg0: i32) -> (i32, i32) {
    %c0_i32 = arith.constant 0 : i32
    %c0_i32_0 = arith.constant 0 : i32
    %c0_i32_1 = arith.constant 0 : i32
    return %c0_i32, %c0_i32_0 : i32, i32
  }
  func.func @transform_7(%arg0: i32) -> (i32, i32) {
    %c0_i32 = arith.constant 0 : i32
    %c0_i32_0 = arith.constant 0 : i32
    %c0_i32_1 = arith.constant 0 : i32
    return %c0_i32, %c0_i32_0 : i32, i32
  }
  func.func @transform_8(%arg0: i32) -> (i32, i32) {
    %c0_i32 = arith.constant 0 : i32
    %c0_i32_0 = arith.constant 0 : i32
    %c0_i32_1 = arith.constant 0 : i32
    return %c0_i32, %c0_i32_0 : i32, i32
  }
  func.func @transform_9(%arg0: i32) -> (i32, i32) {
    %c0_i32 = arith.constant 0 : i32
    %c0_i32_0 = arith.constant 0 : i32
    %c0_i32_1 = arith.constant 0 : i32
    return %c0_i32, %c0_i32_0 : i32, i32
  }
  func.func @transform_10(%arg0: i32) -> (i32, i32) {
    %c0_i32 = arith.constant 0 : i32
    %c0_i32_0 = arith.constant 0 : i32
    %c0_i32_1 = arith.constant 0 : i32
    return %c0_i32, %c0_i32_0 : i32, i32
  }
  func.func @transform_11(%arg0: i32) -> (i32, i32) {
    %c0_i32 = arith.constant 0 : i32
    %c0_i32_0 = arith.constant 0 : i32
    return %arg0, %c0_i32 : i32, i32
  }
}

</mosaic_0001>

<bundles_post_ra>
// kernel: critic_forward.1
= control target key start
LH: loop header
LB: loop body
LE: loop exit
PB: predicated region body
PF: predicated region fallthrough
CT: control target
= control target key end

     0   :  { %16 = vsyncpa [#allocation3], 0  ;;  %s840_s0 = inlined_call_operand.vmem [shape: bf16[2,24], index: 0, kind: input, shape index: {}]   ;;  %s841_s1 = inlined_call_operand.vmem [shape: bf16[2,8], index: 1, kind: input, shape index: {}]   ;;  %s842_s2 = inlined_call_operand.vmem [shape: bf16[24,32], index: 2, kind: input, shape index: {}]   ;;  %s843_s3 = inlined_call_operand.vmem [shape: bf16[8,32], index: 3, kind: input, shape index: {}]   ;;  %s844_s4 = inlined_call_operand.vmem [shape: bf16[32,32], index: 4, kind: input, shape index: {}]   ;;  %s845_s5 = inlined_call_operand.vmem [shape: bf16[32,32], index: 5, kind: input, shape index: {}]   ;;  %s846_s6 = inlined_call_operand.vmem [shape: bf16[32,4], index: 6, kind: input, shape index: {}]   ;;  %s847_s7 = inlined_call_operand.hbm [shape: f32[1,32], index: 7, kind: input, shape index: {}]   ;;  %s848_s8 = inlined_call_operand.hbm [shape: f32[1,32], index: 8, kind: input, shape index: {}]   ;;  %s849_s9 = inlined_call_operand.hbm [shape: f32[1,32], index: 9, kind: input, shape index: {}]   ;;  %s850_s10 = inlined_call_operand.hbm [shape: f32[1,4], index: 10, kind: input, shape index: {}]   ;;  %s851_s11 = inlined_call_operand.hbm [shape: f32[2,4], index: 11, kind: output, shape index: {}]  }
   0x1   :  { %17 = vsyncpa [#allocation6], 0 }
   0x2   :  { %18 = vsyncpa [#allocation9], 0 }
   0x3   :  { %19 = vsyncpa [#allocation4], 0  ;;  %s658_s17 = smov [#allocation5]   ;;  %s659_s19 = smov [#allocation2]  }
   0x4   :  { %s50_s18 = sshll.u32 %s658_s17, 4  ;;  %s40_s20 = sshll.u32 %s659_s19, 4  ;;  %s51_s18 = int_to_ptr.vmem [resolvable:$true] %s50_s18  ;;  %s41_s20 = int_to_ptr.vmem [resolvable:$true] %s40_s20 }
   0x5   :  { %s540_s23 = scalar_lea.hbm %s848_s8, 16 }
   0x6   :  { %p541_p0 = scmp.ne.s32.totalorder %s848_s8, %s540_s23  ;;  %p544_p1 = scmp.lt.u32.totalorder %s540_s23, %s848_s8 }
   0x8   :  { %p546_p2 = pnand %p544_p1, %p541_p0 }
   0xa   :  { %549 = shalt.err (!%p546_p2)
}
   0xb   :  { %s550_s28 = scalar_lea.vmem %s51_s18, 16  ;;  %s554_s29 = scalar_lea.vmem %s51_s18, 32 }
   0xc   :  { %p551_p3 = scmp.ne.s32.totalorder %s51_s18, %s550_s28  ;;  %p555_p4 = scmp.lt.s32.totalorder %s51_s18, %s51_s18 }
   0xd   :  { %p556_p5 = scmp.lt.s32.totalorder %s554_s29, %s550_s28 }
   0xf   :  { %p557_p6 = por %p556_p5, %p555_p4 }
  0x11   :  { %p558_p7 = pnand %p557_p6, %p551_p3 }
  0x13   :  { %561 = shalt.err (!%p558_p7)
}
  0x14   :  { %53 = dma.hbm_to_vmem [thread:$0]  %s848_s8, 16, %s51_s18, [#allocation6]  }
  0x15   :  { %s562_s15 = scalar_lea.hbm %s847_s7, 16 }
  0x16   :  { %p563_p8 = scmp.ne.s32.totalorder %s847_s7, %s562_s15  ;;  %p566_p9 = scmp.lt.u32.totalorder %s562_s15, %s847_s7 }
  0x18   :  { %p568_p10 = pnand %p566_p9, %p563_p8 }
  0x1a   :  { %571 = shalt.err (!%p568_p10)
}
  0x1b   :  { %s572_s22 = scalar_lea.vmem %s41_s20, 16  ;;  %s576_s23 = scalar_lea.vmem %s41_s20, 32 }
  0x1c   :  { %p573_p11 = scmp.ne.s32.totalorder %s41_s20, %s572_s22  ;;  %p577_p12 = scmp.lt.s32.totalorder %s41_s20, %s41_s20 }
  0x1d   :  { %p578_p13 = scmp.lt.s32.totalorder %s576_s23, %s572_s22 }
  0x1f   :  { %p579_p0 = por %p578_p13, %p577_p12 }
  0x21   :  { %p580_p1 = pnand %p579_p0, %p573_p11 }
  0x23   :  { %583 = shalt.err (!%p580_p1)
}
  0x24   :  { %43 = dma.hbm_to_vmem [thread:$0]  %s847_s7, 16, %s41_s20, [#allocation3]  }
  0x25   :  { %s660_s24 = smov [#allocation7]   ;;  %s661_s26 = smov [#allocation8]  }
  0x26   :  { %s60_s25 = sshll.u32 %s660_s24, 4  ;;  %s70_s27 = sshll.u32 %s661_s26, 4  ;;  %s61_s25 = int_to_ptr.vmem [resolvable:$true] %s60_s25  ;;  %s71_s27 = int_to_ptr.vmem [resolvable:$true] %s70_s27 }
  0x27   :  { %s584_s30 = scalar_lea.hbm %s849_s9, 16 }
  0x28   :  { %p585_p2 = scmp.ne.s32.totalorder %s849_s9, %s584_s30  ;;  %p588_p3 = scmp.lt.u32.totalorder %s584_s30, %s849_s9 }
  0x2a   :  { %p590_p4 = pnand %p588_p3, %p585_p2 }
  0x2c   :  { %593 = shalt.err (!%p590_p4)
}
  0x2d   :  { %s594_s7 = scalar_lea.vmem %s61_s25, 16  ;;  %s598_s20 = scalar_lea.vmem %s61_s25, 32 }
  0x2e   :  { %p595_p5 = scmp.ne.s32.totalorder %s61_s25, %s594_s7  ;;  %p599_p6 = scmp.lt.s32.totalorder %s61_s25, %s61_s25 }
  0x2f   :  { %p600_p7 = scmp.lt.s32.totalorder %s598_s20, %s594_s7 }
  0x31   :  { %p601_p8 = por %p600_p7, %p599_p6 }
  0x33   :  { %p602_p9 = pnand %p601_p8, %p595_p5 }
  0x35   :  { %605 = shalt.err (!%p602_p9)
}
  0x36   :  { %63 = dma.hbm_to_vmem [thread:$0]  %s849_s9, 16, %s61_s25, [#allocation6]  }
  0x37   :  { %s606_s22 = scalar_lea.hbm %s850_s10, 16 }
  0x38   :  { %p607_p10 = scmp.ne.s32.totalorder %s850_s10, %s606_s22  ;;  %p610_p11 = scmp.lt.u32.totalorder %s606_s22, %s850_s10 }
  0x3a   :  { %p612_p12 = pnand %p610_p11, %p607_p10 }
  0x3c   :  { %615 = shalt.err (!%p612_p12)
}
  0x3d   :  { %s616_s26 = scalar_lea.vmem %s71_s27, 16  ;;  %s620_s28 = scalar_lea.vmem %s71_s27, 32 }
  0x3e   :  { %p617_p13 = scmp.ne.s32.totalorder %s71_s27, %s616_s26  ;;  %p621_p0 = scmp.lt.s32.totalorder %s71_s27, %s71_s27 }
  0x3f   :  { %p622_p1 = scmp.lt.s32.totalorder %s620_s28, %s616_s26 }
  0x41   :  { %p623_p2 = por %p622_p1, %p621_p0 }
  0x43   :  { %p624_p3 = pnand %p623_p2, %p617_p13 }
  0x45   :  { %627 = shalt.err (!%p624_p3)
}
  0x46   :  { %73 = dma.hbm_to_vmem [thread:$0]  %s850_s10, 16, %s71_s27, [#allocation9]  }
  0x47   :  { %650 = dma.done.wait [#allocation3], 16  }
  0x48   :  { %651 = vsyncadd [#allocation3], 4294967280 }
  0x49   :  { %652 = dma.done.wait [#allocation6], 32  }
  0x4a   :  { %653 = vsyncadd [#allocation6], 4294967264 }
  0x4b   :  { %654 = dma.done.wait [#allocation9], 16  }
  0x4c   :  { %655 = vsyncadd [#allocation9], 4294967280  ;;  %v662_v0 = vmov 0.0   ;;  %vm663_vm0 = vmmov 0   ;;  %vm97_vm1 = vcmask 1043456   ;;  %v518_v1 = vld [vmem:[%s842_s2] sm:$0xff]  }
  0x4d   :  { %479 = vmatprep.subr.bf16.mxu1 %v662_v0  ;;  %473 = vmatprep.subr.bf16.mxu0 %v662_v0  ;;  %v92_v2 = vld [vmem:[%s843_s3] sm:$0xf]  ;;  %vm93_vm2 = vcmask 64512   ;;  %v519_v5 = vld [vmem:[%s842_s2 + $0x8] ss:$0 sps:$4 sm:$0xff]   ;;  %vm150_vm3 = vcmask 195584  }
  0x4e   :  { %475 = vmatprep.mubr.msk.bf16.mxu0 %vm663_vm0, %v662_v0  ;;  %483 = vmatprep.mubr.msk.bf16.mxu1 %vm663_vm0, %v662_v0  ;;  %v99_v3 = vsel %vm97_vm1, %v92_v2, 0  ;;  %v88_v4 = vld [vmem:[%s841_s1] sm:$0x1]  ;;  %v155_v6 = vsel %vm97_vm1, %v519_v5, 0  ;;  %v521_v9 = vld [vmem:[%s844_s4 + $0x8] sm:$0xff]   ;;  %vm234_vm4 = vcmask 261120  }
  0x4f   :  { %480 = vmatpush3.bf16.msra.mxu1 %v518_v1  ;;  %474 = vmatpush3.bf16.msra.mxu0 %v99_v3  ;;  %v87_v7 = vld [vmem:[%s840_s0] sm:$0x1]  ;;  %v523_v28 = vld [vmem:[%s845_s5 + $0x8] sm:$0xff]   ;;  %v447_v29 = vld [vmem:[#allocation5] ss:$0 sm:$0xff]  ;;  %vm423_vm5 = vcmask 25600  }
  0x50   :  { %481 = vmatprep.subr.bf16.mxu1 %v662_v0  ;;  %487 = vmatprep.subr.bf16.mxu0 %v662_v0  ;;  %v520_v8 = vld [vmem:[%s844_s4] sm:$0xff]   ;;  %v525_v42 = vld [vmem:[%s846_s6 + $0x8] sm:$0xff]  }
  0x51   :  { %v446_v15 = vld [vmem:[#allocation2] ss:$0 sm:$0xff]  ;;  %v451_v43 = vld [vmem:[#allocation7] ss:$0 sm:$0xff]  ;;  %v455_v55 = vld [vmem:[#allocation8] ss:$0 sm:$0xff] }
  0x52   :  { %476 = vmatmul.mubr.msk.bf16.vlgmr.msra.gmra.mrb[0].mxu0 %vm93_vm2, %v88_v4  ;;  %v522_v27 = vld [vmem:[%s845_s5] sm:$0xff]  }
  0x53   :  { %482 = vmatpush3.bf16.msra.mxu1 %v155_v6  ;;  %491 = vmatprep.mubr.msk.bf16.mxu0 %vm663_vm0, %v662_v0  ;;  %v524_v41 = vld [vmem:[%s846_s6] sm:$0xff]   ;;  %s664_s6 = smov [#allocation10]  }
  0x54   :  { %495 = vmatprep.subr.bf16.mxu1 %v662_v0  ;;  %488 = vmatpush3.bf16.msra.mxu0 %v520_v8  ;;  %s431_s8 = sshll.u32 %s664_s6, 4  ;;  %s432_s8 = int_to_ptr.vmem [resolvable:$true] %s431_s8 }
  0x55   :  { %489 = vmatprep.subr.bf16.mxu0 %v662_v0  ;;  %s628_s18 = scalar_lea.vmem %s432_s8, 32  ;;  %p633_p5 = scmp.lt.s32.totalorder %s432_s8, %s432_s8 }
  0x56   :  { %484 = vmatmul.mubr.msk.bf16.vlgmr.msra.gmra.mrb[0].mxu1 %vm150_vm3, %v87_v7  ;;  %p629_p4 = scmp.ne.s32.totalorder %s432_s8, %s628_s18  ;;  %p634_p6 = scmp.lt.s32.totalorder %s628_s18, %s628_s18 }
  0x57   :  { %499 = vmatprep.mubr.msk.bf16.mxu1 %vm663_vm0, %v662_v0  ;;  %496 = vmatpush3.bf16.msra.mxu1 %v522_v27 }
  0x58   :  { %490 = vmatpush3.bf16.msra.mxu0 %v521_v9  ;;  %497 = vmatprep.subr.bf16.mxu1 %v662_v0  ;;  %p635_p7 = por %p634_p6, %p633_p5 }
  0x59   :  { %503 = vmatprep.subr.bf16.mxu0 %v662_v0 }
  0x5a   :  { %p636_p8 = pnand %p635_p7, %p629_p4 }
  0x5b   :  { %498 = vmatpush3.bf16.msra.mxu1 %v523_v28 }
 0x125   :  { %v135_v10 = vpop.f32.mrb[0].mxu0 }
 0x126   :  { %v477_v11 = vpop.f32.mrb[1].mxu0 }
 0x127   :  { %v138_v12 = vpop.f32.mrb[2].mxu0 }
 0x128   :  { %v478_v13 = vpop.f32.mrb[3].mxu0 }
 0x129   :  { %v191_v14 = vpop.f32.mrb[0].mxu1 }
 0x12a   :  { %v192_v16 = vadd.f32 %v191_v14, %v135_v10  ;;  %v485_v17 = vpop.f32.mrb[1].mxu1 }
 0x12b   :  { %v194_v18 = vpop.f32.mrb[2].mxu1 }
 0x12c   :  { %v204_v19 = vadd.f32 %v446_v15, %v192_v16  ;;  %v486_v20 = vpop.f32.mrb[3].mxu1 }
 0x12e   :  { %v205_v21 = vsub.f32 0.0, %v204_v19 }
 0x130   :  { %v206_v22 = vmul.f32 1.442695, %v205_v21 }
 0x132   :  { %526 = vpow2.f32 %v206_v22 }
 0x13c   :  { %v527_v23 = vpop.eup %526 }
 0x13d   :  { %v208_v24 = vadd.f32 1.0, %v527_v23 }
 0x13f   :  { %528 = vrcp.f32 %v208_v24 }
 0x149   :  { %v529_v25 = vpop.eup %528 }
 0x14a   :  { %v210_v26 = vpack.c.bf16 %v529_v25, %v529_v25 }
 0x14c   :  { %492 = vmatmul.mubr.msk.bf16.vlgmr.msra.gmra.mrb[4].mxu0 %vm234_vm4, %v210_v26 }
 0x14d   :  { %507 = vmatprep.mubr.msk.bf16.mxu0 %vm663_vm0, %v662_v0  ;;  %504 = vmatpush3.bf16.msra.mxu0 %v524_v41 }
 0x14e   :  { %505 = vmatprep.subr.bf16.mxu0 %v662_v0 }
 0x151   :  { %506 = vmatpush3.bf16.msra.mxu0 %v525_v42 }
 0x21f   :  { %v272_v30 = vpop.f32.mrb[4].mxu0 }
 0x220   :  { %v273_v31 = vadd.f32 %v447_v29, %v272_v30  ;;  %v493_v32 = vpop.f32.mrb[5].mxu0 }
 0x221   :  { %v275_v33 = vpop.f32.mrb[6].mxu0 }
 0x222   :  { %v278_v34 = vsub.f32 0.0, %v273_v31  ;;  %v494_v35 = vpop.f32.mrb[7].mxu0 }
 0x224   :  { %v279_v36 = vmul.f32 1.442695, %v278_v34 }
 0x226   :  { %530 = vpow2.f32 %v279_v36 }
 0x230   :  { %v531_v37 = vpop.eup %530 }
 0x231   :  { %v281_v38 = vadd.f32 1.0, %v531_v37 }
 0x233   :  { %532 = vrcp.f32 %v281_v38 }
 0x23d   :  { %v533_v39 = vpop.eup %532 }
 0x23e   :  { %v283_v40 = vpack.c.bf16 %v533_v39, %v533_v39 }
 0x240   :  { %500 = vmatmul.mubr.msk.bf16.vlgmr.msra.gmra.mrb[4].mxu1 %vm234_vm4, %v283_v40 }
 0x313   :  { %v344_v44 = vpop.f32.mrb[4].mxu1 }
 0x314   :  { %v345_v45 = vadd.f32 %v451_v43, %v344_v44  ;;  %v501_v46 = vpop.f32.mrb[5].mxu1 }
 0x315   :  { %v347_v47 = vpop.f32.mrb[6].mxu1 }
 0x316   :  { %v350_v48 = vsub.f32 0.0, %v345_v45  ;;  %v502_v49 = vpop.f32.mrb[7].mxu1 }
 0x318   :  { %v351_v50 = vmul.f32 1.442695, %v350_v48 }
 0x31a   :  { %534 = vpow2.f32 %v351_v50 }
 0x324   :  { %v535_v51 = vpop.eup %534 }
 0x325   :  { %v353_v52 = vadd.f32 1.0, %v535_v51 }
 0x327   :  { %536 = vrcp.f32 %v353_v52 }
 0x331   :  { %v537_v53 = vpop.eup %536 }
 0x332   :  { %v355_v54 = vpack.c.bf16 %v537_v53, %v537_v53 }
 0x334   :  { %508 = vmatmul.mubr.msk.bf16.vlgmr.msra.gmra.mrb[8].mxu0 %vm234_vm4, %v355_v54 }
 0x407   :  { %v416_v56 = vpop.f32.mrb[8].mxu0 }
 0x408   :  { %v417_v57 = vadd.f32 %v455_v55, %v416_v56  ;;  %v509_v58 = vpop.f32.mrb[9].mxu0 }
 0x409   :  { %v419_v59 = vpop.f32.mrb[10].mxu0 }
 0x40a   :  { %538 = vtanh.f32 %v417_v57  ;;  %v510_v60 = vpop.f32.mrb[11].mxu0 }
 0x414   :  { %v539_v61 = vpop.eup %538 }
 0x415   :  { %424 = vst.msk [vmem:[#allocation10] sm:$0x3] %vm423_vm5, %v539_v61 }
 0x416   :  { %639 = shalt.err (!%p636_p8)
}
 0x417   :  { %s640_s28 = scalar_lea.hbm %s851_s11, 32 }
 0x418   :  { %p641_p9 = scmp.ne.s32.totalorder %s851_s11, %s640_s28  ;;  %p644_p10 = scmp.lt.u32.totalorder %s640_s28, %s851_s11 }
 0x41a   :  { %p646_p11 = pnand %p644_p10, %p641_p9 }
 0x41c   :  { %649 = shalt.err (!%p646_p11)
}
 0x41d   :  { %434 = dma.vmem_to_hbm [thread:$0]  %s432_s8, 32, %s851_s11, [#allocation4]  }
 0x41e   :  { %656 = dma.done.wait [#allocation4], 32  }
 0x41f   :  { %657 = vsyncadd [#allocation4], 4294967264 }
 0x420   :  { %438 = vsyncpa [#allocation3], 1 }
 0x421   :  { %439 = vsyncpa [#allocation6], 1 }
 0x422   :  { %440 = vsyncpa [#allocation9], 1 }
 0x423   :  { %441 = vsyncpa [#allocation4], 1 }

</bundles_post_ra>
